<compile_context>
chip_gen: v7x
topology: tpu7x:2x2x1
jax: 0.10.0
libtpu: 0.0.40
codegen_flags: <defaults>
</compile_context>

<pallas_src>
import functools

import jax
import jax.numpy as jnp
from jax import lax
from jax.experimental import pallas as pl
from jax.experimental.pallas import tpu as pltpu


def _round_up(x, m):
    return (x + m - 1) // m * m


def _cdiv(a, b):
    return -(-a // b)


def _pick_row_block(rows, r_max):
    """Sublane-aligned row tile; keep >=2 row blocks when possible so the 'parallel'
    axis can shard across both TensorCores on v7x (near-neutral on v5e/v6e)."""
    r = min(max(8, r_max), _round_up(rows, 8))
    if rows > 8:
        r = min(r, _round_up(_cdiv(rows, 2), 8))
    return max(r, 8)


def _pow_p(xc, p_ref, p_int):
    """clamp-ed positive x raised to p. Integer p -> repeated VPU multiplies
    (no EUP transcendentals); general learnable p -> exp(p*log(x))."""
    if p_int is not None:
        xp = xc
        for _ in range(int(p_int) - 1):
            xp = xp * xc
        return xp
    p = p_ref[0, 0]
    return jnp.exp(p * jnp.log(xc))


def _gem_kernel_single(x_ref, p_ref, o_ref, *, eps, n_valid, p_int, mask_cols):
    """Whole spatial extent in one block (L == n): reduce and finalize in one step."""
    x = x_ref[...].astype(jnp.float32)
    xc = jnp.maximum(x, eps)                       # clamp(min=eps)
    xp = _pow_p(xc, p_ref, p_int)

    if mask_cols:
        # n is not a 128-multiple: zero the padded lanes of the last vreg column so
        # stale-VMEM garbage (possibly NaN) can't leak into the lane reduction.
        col = lax.broadcasted_iota(jnp.int32, xp.shape, 1)
        xp = jnp.where(col < n_valid, xp, 0.0)

    pooled = jnp.sum(xp, axis=-1, keepdims=True) * (1.0 / n_valid)
    p = p_ref[0, 0]
    o_ref[...] = jnp.exp(jnp.log(pooled) / p).astype(o_ref.dtype)


def _gem_kernel_multi(x_ref, p_ref, o_ref, acc_ref, *,
                      eps, n_valid, col_block, p_int, mask_last):
    """Row tiles x spatial-reduction tiles. Per tile: partial-reduce (R,L)->(R,128)
    with lane-aligned static slices (pure VPU), accumulate into a small VMEM scratch;
    a single cross-lane (XLU) reduce + mean + ^(1/p) on the last reduction step."""
    k = pl.program_id(1)
    nk = pl.num_programs(1)

    x = x_ref[...].astype(jnp.float32)
    xc = jnp.maximum(x, eps)                       # clamp(min=eps)
    xp = _pow_p(xc, p_ref, p_int)

    def lane_fold(v):
        # (R, L) -> (R, 128): sum of static lane-aligned slices; no XLU / relayout.
        out = v[:, 0:128]
        for j in range(1, col_block // 128):
            out = out + v[:, j * 128:(j + 1) * 128]
        return out

    folded = lane_fold(xp)

    @pl.when(k == 0)
    def _init():
        acc_ref[...] = folded                      # init with first tap (no zeros+add)

    @pl.when(jnp.logical_and(k > 0, k < nk - 1))
    def _accum():
        acc_ref[...] = acc_ref[...] + folded       # cheap VPU accumulation

    @pl.when(k == nk - 1)
    def _finalize():
        if mask_last:
            # Mask only the ragged LAST tile (there is no physical padding in HBM;
            # out-of-bounds lanes of this block contain garbage, possibly NaN).
            col = k * col_block + lax.broadcasted_iota(jnp.int32, xp.shape, 1)
            last = lane_fold(jnp.where(col < n_valid, xp, 0.0))
        else:
            last = folded
        total = acc_ref[...] + last
        pooled = jnp.sum(total, axis=-1, keepdims=True) * (1.0 / n_valid)
        p = p_ref[0, 0]
        o_ref[...] = jnp.exp(jnp.log(pooled) / p).astype(o_ref.dtype)


def gem_pallas(x, p, *, eps=1e-6, p_int_hint=None, row_block=512, col_block=2048):
    """GeM pooling. x: (B, C, H, W); p: (1,) float (the nn.Parameter).

    `p_int_hint`, if given, must equal the runtime value of `p`; the kernel then
    computes x^p with repeated VPU multiplies (fast path for the default p=3).
    The hint is validated whenever `p` is a concrete (non-traced) value.
    """
    if col_block % 128 != 0:
        raise ValueError("col_block must be a multiple of 128")
    if p_int_hint is not None:
        if int(p_int_hint) != p_int_hint or p_int_hint < 1:
            raise ValueError("p_int_hint must be a positive integer")
        try:
            pv = float(jnp.asarray(p).reshape(-1)[0])
        except jax.errors.ConcretizationTypeError:
            pv = None                              # traced p: caller is responsible
        if pv is not None and abs(pv - p_int_hint) > 1e-6:
            raise ValueError(
                f"p_int_hint={p_int_hint} does not match runtime p={pv}")

    B, C, H, W = x.shape
    n = H * W
    rows = B * C
    itemsize = jnp.dtype(x.dtype).itemsize

    # NCHW -> (B*C, H*W): pure reshape (no transpose, no cast, no pad); the large
    # spatial reduction lands on the dense 128-lane axis, channels on sublanes.
    x2 = x.reshape(rows, n)
    p_arr = jnp.asarray(p, jnp.float32).reshape(1, 1)      # scalar in SMEM

    if n <= col_block:
        # Single reduction step: block last dim == full array dim (no lane padding,
        # no accumulator, one contiguous DMA per row block).
        budget = 4 << 20                                   # ~4 MiB input block
        r_max = min(1024, max(8, (budget // max(1, n * itemsize)) // 8 * 8))
        R = _pick_row_block(rows, r_max)
        grid = (_cdiv(rows, R),)
        kernel = functools.partial(
            _gem_kernel_single, eps=eps, n_valid=n, p_int=p_int_hint,
            mask_cols=(n % 128 != 0))
        in_specs = [pl.BlockSpec((R, n), lambda i: (i, 0)),
                    pl.BlockSpec(memory_space=pltpu.MemorySpace.SMEM)]
        out_specs = pl.BlockSpec((R, 1), lambda i: (i, 0))
        scratch_shapes = []
        dims = ("parallel",)
    else:
        # Multi-step reduction: pick L to minimize the ragged tail (no physical pad).
        R = _pick_row_block(rows, row_block)
        steps = _cdiv(n, col_block)
        L = _round_up(_cdiv(n, steps), 128)
        kt = _cdiv(n, L)                                   # >= 2 by construction
        grid = (_cdiv(rows, R), kt)
        kernel = functools.partial(
            _gem_kernel_multi, eps=eps, n_valid=n, col_block=L,
            p_int=p_int_hint, mask_last=(n % L != 0))
        in_specs = [pl.BlockSpec((R, L), lambda i, k: (i, k)),
                    pl.BlockSpec(memory_space=pltpu.MemorySpace.SMEM)]
        out_specs = pl.BlockSpec((R, 1), lambda i, k: (i, 0))
        scratch_shapes = [pltpu.VMEM((R, 128), jnp.float32)]
        dims = ("parallel", "arbitrary")

    if p_int_hint is not None:
        flops = rows * n * (int(p_int_hint) + 2)
        transcendentals = 3 * rows
    else:
        flops = rows * n * 3
        transcendentals = 2 * rows * n + 3 * rows
    cost = pl.CostEstimate(
        flops=flops, transcendentals=transcendentals,
        bytes_accessed=rows * n * itemsize + rows * 4 + 4)

    out = pl.pallas_call(
        kernel,
        out_shape=jax.ShapeDtypeStruct((rows, 1), jnp.float32),
        grid_spec=pltpu.PrefetchScalarGridSpec(
            num_scalar_prefetch=0,
            grid=grid,
            in_specs=in_specs,
            out_specs=out_specs,
            scratch_shapes=scratch_shapes),
        compiler_params=pltpu.CompilerParams(
            dimension_semantics=dims,
            vmem_limit_bytes=32 * 1024 * 1024),
        cost_estimate=cost,
    )(x2, p_arr)

    return out.reshape(B, C, 1, 1)


def _int_hint_from_p(p):
    pv = float(jnp.asarray(p).reshape(-1)[0])
    return int(round(pv)) if abs(pv - round(pv)) < 1e-6 else None


def _gem_reference(x, p, eps=1e-6):
    xc = jnp.maximum(x.astype(jnp.float32), eps)
    pooled = jnp.mean(xc ** p, axis=(2, 3), keepdims=True)
    return pooled ** (1.0 / p)


if __name__ == "__main__":
    key = jax.random.PRNGKey(0)
    k1, k2, k3 = jax.random.split(key, 3)

    # nn.Parameter(torch.ones(1) * 3)
    p_param = jnp.ones((1,), jnp.float32) * 3.0
    hint = _int_hint_from_p(p_param)               # derived from the concrete p

    # (a) default module config: f32, p=3 fast path, single reduction step (n=256).
    x = jax.random.normal(k1, (2, 4, 16, 16), jnp.float32)
    gem_fast = jax.jit(functools.partial(gem_pallas, p_int_hint=hint))
    out = gem_fast(x, p_param)
    jax.block_until_ready(out)
    ref = _gem_reference(x, 3.0)
    assert out.shape == (2, 4, 1, 1), out.shape
    assert bool(jnp.all(jnp.isfinite(out)))
    assert bool(jnp.allclose(out, ref, rtol=1e-4, atol=1e-5))

    # (b) general learnable-p path (exp/log), same inputs.
    out_gen = jax.jit(gem_pallas)(x, p_param)
    jax.block_until_ready(out_gen)
    assert bool(jnp.allclose(out_gen, ref, rtol=1e-4, atol=1e-5))

    # (c) non-128-multiple spatial size, single step with L == n (full-dim block,
    #     no physical padding; padded lanes masked in-kernel).
    x_odd = jax.random.normal(k2, (2, 4, 18, 18), jnp.float32)
    out_odd = jax.jit(functools.partial(gem_pallas, p_int_hint=hint))(x_odd, p_param)
    jax.block_until_ready(out_odd)
    ref_odd = _gem_reference(x_odd, 3.0)
    assert out_odd.shape == (2, 4, 1, 1)
    assert bool(jnp.allclose(out_odd, ref_odd, rtol=1e-4, atol=1e-5))

    # (d) multi-step reduction grid with a ragged last tile (exercises the (R,128)
    #     accumulator, last-tile-only mask, and ragged HBM blocks without padding).
    out_multi = jax.jit(functools.partial(gem_pallas, p_int_hint=hint, col_block=128))(
        x_odd, p_param)
    jax.block_until_ready(out_multi)
    assert bool(jnp.allclose(out_multi, ref_odd, rtol=1e-4, atol=1e-5))

    # (e) native bf16 ingestion: no wrapper-side cast, kernel casts per-tile to f32.
    x_bf = jax.random.normal(k3, (2, 4, 16, 16), jnp.bfloat16)
    out_bf = jax.jit(functools.partial(gem_pallas, p_int_hint=hint))(x_bf, p_param)
    jax.block_until_ready(out_bf)
    ref_bf = _gem_reference(x_bf.astype(jnp.float32), 3.0)
    assert bool(jnp.allclose(out_bf, ref_bf, rtol=1e-3, atol=1e-4))

    print("KERNEL_OK")
</pallas_src>

<mosaic_0001>
module attributes {stable_mosaic.version = 11 : i64} {
  func.func @_gem_kernel_single(%arg0: i32, %arg1: memref<8x256xf32, #tpu.memory_space<vmem>>, %arg2: memref<1x1xf32, #tpu.memory_space<smem>>, %arg3: memref<8x1xf32, #tpu.memory_space<vmem>>) attributes {dimension_semantics = [#tpu.dimension_semantics<parallel>], iteration_bounds = array<i64: 1>, scalar_prefetch = 0 : i64, scratch_operands = 0 : i64, tpu.core_type = #tpu.core_type<tc>, window_params = [{transform_indices = @transform_0, window_bounds = array<i64: 8, 256>}, {transform_indices = @transform_1, window_bounds = array<i64: 1, 1>}, {transform_indices = @transform_2, window_bounds = array<i64: 8, 1>}]} {
    %c0 = arith.constant 0 : index
    %c0_0 = arith.constant 0 : index
    %0 = vector.load %arg1[%c0, %c0_0] : memref<8x256xf32, #tpu.memory_space<vmem>>, vector<8x256xf32>
    %cst = arith.constant 9.99999997E-7 : f32
    %1 = vector.broadcast %cst : f32 to vector<8x256xf32>
    %2 = arith.maximumf %0, %1 : vector<8x256xf32>
    %3 = arith.mulf %2, %2 : vector<8x256xf32>
    %4 = arith.mulf %3, %2 : vector<8x256xf32>
    %cst_1 = arith.constant dense<0.000000e+00> : vector<8xf32>
    %5 = vector.multi_reduction <add>, %4, %cst_1 [1] : vector<8x256xf32> to vector<8xf32>
    %6 = vector.shape_cast %5 : vector<8xf32> to vector<8x1xf32>
    %cst_2 = arith.constant 3.906250e-03 : f32
    %7 = vector.broadcast %cst_2 : f32 to vector<8x1xf32>
    %8 = arith.mulf %6, %7 : vector<8x1xf32>
    %c0_3 = arith.constant 0 : index
    %c0_4 = arith.constant 0 : index
    %9 = memref.load %arg2[%c0_3, %c0_4] : memref<1x1xf32, #tpu.memory_space<smem>>
    %10 = math.log %8 : vector<8x1xf32>
    %11 = vector.broadcast %9 : f32 to vector<8x1xf32>
    %12 = arith.divf %10, %11 : vector<8x1xf32>
    %13 = math.exp %12 : vector<8x1xf32>
    %c0_5 = arith.constant 0 : index
    %c0_6 = arith.constant 0 : index
    %14 = vector.load %arg3[%c0_5, %c0_6] : memref<8x1xf32, #tpu.memory_space<vmem>>, vector<8x1xf32>
    tpu.vector_store %arg3[%c0_5, %c0_6], %13 {strides = array<i32>} : memref<8x1xf32, #tpu.memory_space<vmem>>, vector<8x1xf32>,
    return
  }
  func.func @transform_0(%arg0: i32) -> (i32, i32) {
    %c0_i32 = arith.constant 0 : i32
    %c0_i32_0 = arith.constant 0 : i32
    return %arg0, %c0_i32 : i32, i32
  }
  func.func @transform_1(%arg0: i32) -> (i32, i32) {
    %c0_i32 = arith.constant 0 : i32
    %c0_i32_0 = arith.constant 0 : i32
    %c0_i32_1 = arith.constant 0 : i32
    return %c0_i32, %c0_i32_0 : i32, i32
  }
  func.func @transform_2(%arg0: i32) -> (i32, i32) {
    %c0_i32 = arith.constant 0 : i32
    %c0_i32_0 = arith.constant 0 : i32
    return %arg0, %c0_i32 : i32, i32
  }
}

</mosaic_0001>

<bundles_post_ra>
// kernel: gem_pallas.1
= control target key start
LH: loop header
LB: loop body
LE: loop exit
PB: predicated region body
PF: predicated region fallthrough
CT: control target
= control target key end

     0   :  { %vm32_vm0 = vcmask 7168   ;;  %s71_s0 = inlined_call_operand.vmem [shape: f32[8,256], index: 0, kind: input, shape index: {}]   ;;  %s72_s1 = inlined_call_operand.<no memory space> [shape: f32[1,1], index: 1, kind: input, shape index: {}]   ;;  %s73_s2 = inlined_call_operand.vmem [shape: f32[8,1], index: 2, kind: output, shape index: {}]  }
   0x1   :  { %v12_v0 = vld [vmem:[%s71_s0] sm:$0xff]  ;;  %v13_v1 = vld [vmem:[%s71_s0 + $0x8] sm:$0xff]  ;;  %v27_v9 = vstv %s72_s1 }
   0x2   :  { %v14_v2 = vmax.f32 %v12_v0, 1e-06  ;;  %v15_v3 = vmax.f32 %v13_v1, 1e-06  ;;  %38 = vrcp.f32 %v27_v9 }
   0x4   :  { %v16_v4 = vmul.f32 %v14_v2, %v14_v2  ;;  %v17_v5 = vmul.f32 %v15_v3, %v15_v3 }
   0x6   :  { %v18_v6 = vmul.f32 %v16_v4, %v14_v2  ;;  %v19_v7 = vmul.f32 %v17_v5, %v15_v3 }
   0x8   :  { %v20_v8 = vadd.f32 %v19_v7, %v18_v6 }
   0xa   :  { %21 = vadd.xlane.f32.xlu0 %v20_v8 }
   0xc   :  { %v39_v12 = vpop.eup %38 }
  0x97   :  { %v22_v10 = vpop.xlane.xlu0 %21 }
  0x98   :  { %v23_v11 = vmul.f32 0.00390625, %v22_v10 }
  0x9a   :  { %40 = vlog2.f32 %v23_v11 }
  0xa4   :  { %v41_v13 = vpop.eup %40 }
  0xa5   :  { %v26_v14 = vmul.f32 0.6931472, %v41_v13 }
  0xa7   :  { %v29_v15 = vmul.f32 %v39_v12, %v26_v14 }
  0xa9   :  { %v30_v16 = vmul.f32 1.442695, %v29_v15 }
  0xab   :  { %42 = vpow2.f32 %v30_v16 }
  0xb5   :  { %v43_v17 = vpop.eup %42 }
  0xb6   :  { %33 = vst.msk [vmem:[%s73_s2] sm:$0xff] %vm32_vm0, %v43_v17 }

</bundles_post_ra>
